<compile_context>
chip_gen: v7x
topology: tpu7x:2x2x1
jax: 0.10.0
libtpu: 0.0.40
codegen_flags: <defaults>
</compile_context>

<pallas_src>
import jax
import jax.numpy as jnp
from jax.experimental import pallas as pl
from jax.experimental.pallas import tpu as pltpu

NEG_INF = -1e30     # finite "-inf": masked lanes can never produce NaNs in exp/max
LANE = 128          # TPU lane width; tiles keep the last dim a multiple of this
VMEM_LIMIT = 32 * 1024 * 1024   # scoped default; ample headroom on v5e/v6e/v7x here


def _round_up(v, m):
    return (v + m - 1) // m * m


def _full_spec(a):
    nd = a.ndim
    return pl.BlockSpec(a.shape, lambda *_: (0,) * nd)


def attention_forward(x, y, params, *, tn=2048, compute_dtype=jnp.bfloat16,
                      out_dtype=None):
    """Forward pass of the PyTorch `Attention` module (w=None path).

    x: (B, in_dim1, N);  y: (B, in_dim2, N) or (B, in_dim2, 1).
    Returns (B, 128, N) in `out_dtype` (default: `compute_dtype`).

    `tn` is the N-tile width (rounded to a multiple of 128). The 2048 default is
    safe and fast on all TPU generations (v5e/v6e/v7x): the working set is a few
    MiB even at tn=4096, while large tiles keep stores lane-dense and amortise the
    per-grid-step pipeline overhead.
    """
    B, C1, N = x.shape
    By, C2, Ny = y.shape
    assert By == B and Ny in (N, 1)
    out_dim = params["wq"].shape[0]
    a_out = params["ba"].shape[0]
    y_is_bcast = (Ny == 1)
    if out_dtype is None:
        out_dtype = compute_dtype

    wq, bq = params["wq"], params["bq"]
    wk, bk = params["wk"], params["bk"]
    wv, bv = params["wv"], params["bv"]
    wattn, battn = params["wattn"], params["battn"]
    wa, ba = params["wa"], params["ba"]

    # ---- algebraic fusion (exact; composed in f32, cast to compute_dtype once) ----
    # conv_attn(conv_q(x) + conv_k(y)) == Wqa @ x + Wka @ y + b_attn
    wqa = wattn @ wq                           # (out_dim, C1)
    wka = wattn @ wk                           # (out_dim, C2)
    b_attn = wattn @ (bq + bk) + battn         # (out_dim, 1)
    wa_agg, wa_x = wa[:, :out_dim], wa[:, out_dim:]

    # ---- lane-dense N tiling (arrays stay unpadded; the ragged edge is masked) ----
    tn = max(LANE, _round_up(min(tn, _round_up(N, LANE)), LANE))
    n_tiles = (N + tn - 1) // tn
    needs_mask = (n_tiles * tn != N)

    x_c = x.astype(compute_dtype)
    # One MXU pass per x tile: rows [0:out_dim) are the logits weight, rows [out_dim:)
    # are conv_a's x-half.
    wqx = jnp.concatenate([wqa, wa_x], axis=0).astype(compute_dtype)

    if y_is_bcast:
        # conv_k(y)/conv_v(y) produce one output lane each -> hoist to XLA, feed as
        # per-batch (out_dim, 1) bias blocks.
        kbias = jnp.einsum("oc,bcw->bow", wka, y.astype(jnp.float32)) + b_attn[None]
        v_b = jnp.einsum("oc,bcw->bow", wv, y.astype(jnp.float32)) + bv[None]
    else:
        y_c = y.astype(compute_dtype)
        wkv = jnp.concatenate([wka, wv], axis=0).astype(compute_dtype)  # stacked k|v

    # ------------------- single-tile fast path: fully fused softmax -------------------
    if n_tiles == 1:
        wagg_c = wa_agg.astype(compute_dtype)

        def finish(xdot, logits, v, wagg_ref, ba_ref, o_ref):
            if needs_mask:
                col = jax.lax.broadcasted_iota(jnp.int32, logits.shape, 1)
                logits = jnp.where(col < N, logits, NEG_INF)
            m = jnp.max(logits, axis=-1, keepdims=True)
            p = jnp.exp(logits - m)
            z = jnp.sum(p, axis=-1, keepdims=True)
            agg = (p * (1.0 / z) * v).astype(compute_dtype)
            o = (jnp.dot(wagg_ref[...], agg, preferred_element_type=jnp.float32)
                 + xdot[out_dim:] + ba_ref[...])
            o_ref[...] = o.astype(o_ref.dtype)

        if y_is_bcast:
            def kernel(x_ref, wqx_ref, kb_ref, v_ref, wagg_ref, ba_ref, o_ref):
                xdot = jnp.dot(wqx_ref[...], x_ref[...],
                               preferred_element_type=jnp.float32)
                finish(xdot, xdot[:out_dim] + kb_ref[...], v_ref[...],
                       wagg_ref, ba_ref, o_ref)

            in_specs = [pl.BlockSpec((None, C1, tn), lambda b: (b, 0, 0)),
                        _full_spec(wqx),
                        pl.BlockSpec((None, out_dim, 1), lambda b: (b, 0, 0)),
                        pl.BlockSpec((None, out_dim, 1), lambda b: (b, 0, 0)),
                        _full_spec(wagg_c), _full_spec(ba)]
            args = (x_c, wqx, kbias, v_b, wagg_c, ba)
        else:
            def kernel(x_ref, y_ref, wqx_ref, wkv_ref, battn_ref, bv_ref,
                       wagg_ref, ba_ref, o_ref):
                xdot = jnp.dot(wqx_ref[...], x_ref[...],
                               preferred_element_type=jnp.float32)
                kv = jnp.dot(wkv_ref[...], y_ref[...],
                             preferred_element_type=jnp.float32)
                finish(xdot, xdot[:out_dim] + kv[:out_dim] + battn_ref[...],
                       kv[out_dim:] + bv_ref[...], wagg_ref, ba_ref, o_ref)

            in_specs = [pl.BlockSpec((None, C1, tn), lambda b: (b, 0, 0)),
                        pl.BlockSpec((None, C2, tn), lambda b: (b, 0, 0)),
                        _full_spec(wqx), _full_spec(wkv), _full_spec(b_attn),
                        _full_spec(bv), _full_spec(wagg_c), _full_spec(ba)]
            args = (x_c, y_c, wqx, wkv, b_attn, bv, wagg_c, ba)

        return pl.pallas_call(
            kernel,
            out_shape=jax.ShapeDtypeStruct((B, a_out, N), out_dtype),
            grid_spec=pltpu.PrefetchScalarGridSpec(
                num_scalar_prefetch=0, grid=(B,),
                in_specs=in_specs,
                out_specs=pl.BlockSpec((None, a_out, tn), lambda b: (b, 0, 0))),
            compiler_params=pltpu.CompilerParams(
                dimension_semantics=("parallel",),
                vmem_limit_bytes=VMEM_LIMIT),
        )(*args)

    # --------------- pass 1: per-(batch, channel) softmax max & sum(exp) ---------------
    # Split the tile axis so both v7x TensorCores are busy even at tiny B; the per-split
    # (m, l) partials are merged with a logsumexp-combine below.
    n_splits = 2 if n_tiles % 2 == 0 else 1
    tps = n_tiles // n_splits
    wqa_c = wqa.astype(compute_dtype)

    def mask_logits(logits, tile_idx):
        if not needs_mask:
            return logits
        col = jax.lax.broadcasted_iota(jnp.int32, logits.shape, 1) + tile_idx * tn
        return jnp.where(col < N, logits, NEG_INF)

    def stats_body(logits, t, m_ref, l_ref, m_sc, l_sc):
        @pl.when(t == 0)
        def _init():
            m_sc[...] = jnp.full(m_sc.shape, NEG_INF, m_sc.dtype)
            l_sc[...] = jnp.zeros(l_sc.shape, l_sc.dtype)

        m_prev = m_sc[...]
        m_new = jnp.maximum(m_prev, jnp.max(logits, axis=-1, keepdims=True))
        l_sc[...] = (l_sc[...] * jnp.exp(m_prev - m_new)
                     + jnp.sum(jnp.exp(logits - m_new), axis=-1, keepdims=True))
        m_sc[...] = m_new

        @pl.when(t == tps - 1)
        def _fin():
            m_ref[...] = m_sc[...]
            l_ref[...] = l_sc[...]

    if y_is_bcast:
        def stats_kernel(x_ref, wqa_ref, kb_ref, m_ref, l_ref, m_sc, l_sc):
            s, t = pl.program_id(1), pl.program_id(2)
            logits = (jnp.dot(wqa_ref[...], x_ref[...],
                              preferred_element_type=jnp.float32) + kb_ref[...])
            stats_body(mask_logits(logits, s * tps + t), t, m_ref, l_ref, m_sc, l_sc)

        stats_in = [pl.BlockSpec((None, C1, tn), lambda b, s, t: (b, 0, s * tps + t)),
                    _full_spec(wqa_c),
                    pl.BlockSpec((None, out_dim, 1), lambda b, s, t: (b, 0, 0))]
        stats_args = (x_c, wqa_c, kbias)
    else:
        wka_c = wka.astype(compute_dtype)

        def stats_kernel(x_ref, y_ref, wqa_ref, wka_ref, battn_ref,
                         m_ref, l_ref, m_sc, l_sc):
            s, t = pl.program_id(1), pl.program_id(2)
            logits = (jnp.dot(wqa_ref[...], x_ref[...], preferred_element_type=jnp.float32)
                      + jnp.dot(wka_ref[...], y_ref[...], preferred_element_type=jnp.float32)
                      + battn_ref[...])
            stats_body(mask_logits(logits, s * tps + t), t, m_ref, l_ref, m_sc, l_sc)

        stats_in = [pl.BlockSpec((None, C1, tn), lambda b, s, t: (b, 0, s * tps + t)),
                    pl.BlockSpec((None, C2, tn), lambda b, s, t: (b, 0, s * tps + t)),
                    _full_spec(wqa_c), _full_spec(wka_c), _full_spec(b_attn)]
        stats_args = (x_c, y_c, wqa_c, wka_c, b_attn)

    ml_spec = pl.BlockSpec((None, None, out_dim, 1), lambda b, s, t: (b, s, 0, 0))
    m_parts, l_parts = pl.pallas_call(
        stats_kernel,
        out_shape=(jax.ShapeDtypeStruct((B, n_splits, out_dim, 1), jnp.float32),
                   jax.ShapeDtypeStruct((B, n_splits, out_dim, 1), jnp.float32)),
        grid_spec=pltpu.PrefetchScalarGridSpec(
            num_scalar_prefetch=0, grid=(B, n_splits, tps),
            in_specs=stats_in, out_specs=[ml_spec, ml_spec],
            scratch_shapes=[pltpu.VMEM((out_dim, 1), jnp.float32),
                            pltpu.VMEM((out_dim, 1), jnp.float32)]),
        compiler_params=pltpu.CompilerParams(
            dimension_semantics=("parallel", "parallel", "arbitrary"),
            vmem_limit_bytes=VMEM_LIMIT),
    )(*stats_args)

    if n_splits > 1:
        m_stat = jnp.max(m_parts, axis=1)                                # (B, out_dim, 1)
        l_stat = jnp.sum(l_parts * jnp.exp(m_parts - m_stat[:, None]), axis=1)
    else:
        m_stat, l_stat = m_parts[:, 0], l_parts[:, 0]

    # Fold the softmax normaliser 1/Z into the agg-half of conv_a's weight (per batch):
    # (wa_agg / Z) @ (exp(logits - m) * v)  ==  wa_agg @ (softmax(logits) * v).
    wagg_b = (wa_agg[None] * jnp.swapaxes(1.0 / l_stat, 1, 2)).astype(compute_dtype)

    # ------- pass 2: un-normalised attention + fused conv_a, one N tile per step -------
    x_spec2 = pl.BlockSpec((None, C1, tn), lambda b, t: (b, 0, t))
    stat_spec2 = pl.BlockSpec((None, out_dim, 1), lambda b, t: (b, 0, 0))
    wagg_spec2 = pl.BlockSpec((None, a_out, out_dim), lambda b, t: (b, 0, 0))
    out_spec2 = pl.BlockSpec((None, a_out, tn), lambda b, t: (b, 0, t))

    # TODO(synk): for wide in_dim1 it becomes cheaper to write bf16 logits to HBM in
    # pass 1 and reload them here instead of re-reading x and redoing the wqa matmul;
    # at the C1~8 shapes this module uses, recompute wins, so only that path is built.
    if y_is_bcast:
        def out_kernel(x_ref, wqx_ref, kb_ref, v_ref, m_ref, wagg_ref, ba_ref, o_ref):
            xdot = jnp.dot(wqx_ref[...], x_ref[...], preferred_element_type=jnp.float32)
            p = jnp.exp(xdot[:out_dim] + kb_ref[...] - m_ref[...])   # un-normalised attn
            agg = (p * v_ref[...]).astype(compute_dtype)             # 1/Z folded in wagg
            o = (jnp.dot(wagg_ref[...], agg, preferred_element_type=jnp.float32)
                 + xdot[out_dim:] + ba_ref[...])
            o_ref[...] = o.astype(o_ref.dtype)

        out_in = [x_spec2, _full_spec(wqx), stat_spec2, stat_spec2, stat_spec2,
                  wagg_spec2, _full_spec(ba)]
        out_args = (x_c, wqx, kbias, v_b, m_stat, wagg_b, ba)
    else:
        def out_kernel(x_ref, y_ref, wqx_ref, wkv_ref, battn_ref, bv_ref, m_ref,
                       wagg_ref, ba_ref, o_ref):
            xdot = jnp.dot(wqx_ref[...], x_ref[...], preferred_element_type=jnp.float32)
            kv = jnp.dot(wkv_ref[...], y_ref[...], preferred_element_type=jnp.float32)
            p = jnp.exp(xdot[:out_dim] + kv[:out_dim] + battn_ref[...] - m_ref[...])
            agg = (p * (kv[out_dim:] + bv_ref[...])).astype(compute_dtype)
            o = (jnp.dot(wagg_ref[...], agg, preferred_element_type=jnp.float32)
                 + xdot[out_dim:] + ba_ref[...])
            o_ref[...] = o.astype(o_ref.dtype)

        y_spec2 = pl.BlockSpec((None, C2, tn), lambda b, t: (b, 0, t))
        out_in = [x_spec2, y_spec2, _full_spec(wqx), _full_spec(wkv),
                  _full_spec(b_attn), _full_spec(bv), stat_spec2,
                  wagg_spec2, _full_spec(ba)]
        out_args = (x_c, y_c, wqx, wkv, b_attn, bv, m_stat, wagg_b, ba)

    # TODO(synk): optional multiplicative mask `w` (w=None path only); it would be one
    # extra (out_dim, tn) elementwise multiply on `p` before forming `agg`.
    return pl.pallas_call(
        out_kernel,
        out_shape=jax.ShapeDtypeStruct((B, a_out, N), out_dtype),
        grid_spec=pltpu.PrefetchScalarGridSpec(
            num_scalar_prefetch=0, grid=(B, n_tiles),
            in_specs=out_in, out_specs=out_spec2),
        compiler_params=pltpu.CompilerParams(
            dimension_semantics=("parallel", "parallel"),
            vmem_limit_bytes=VMEM_LIMIT),
    )(*out_args)


def init_params(key, in_dim1, in_dim2, out_dim, a_out=128):
    """PyTorch Conv1d-style init (uniform +-1/sqrt(fan_in)); raw, unfused params."""
    keys = jax.random.split(key, 5)

    def lin(k, o, i):
        bound = 1.0 / (i ** 0.5)
        kw, kb = jax.random.split(k)
        w = jax.random.uniform(kw, (o, i), jnp.float32, -bound, bound)
        b = jax.random.uniform(kb, (o, 1), jnp.float32, -bound, bound)
        return w, b

    wq, bq = lin(keys[0], out_dim, in_dim1)
    wk, bk = lin(keys[1], out_dim, in_dim2)
    wv, bv = lin(keys[2], out_dim, in_dim2)
    wattn, battn = lin(keys[3], out_dim, out_dim)
    wa, ba = lin(keys[4], a_out, out_dim + in_dim1)
    return dict(wq=wq, bq=bq, wk=wk, bk=bk, wv=wv, bv=bv,
                wattn=wattn, battn=battn, wa=wa, ba=ba)


def attention_ref(x, y, p):
    """Pure-JAX f32 reference matching the PyTorch forward (w=None)."""
    def conv(w, b, t):
        return jnp.einsum("oi,biw->bow", w, t) + b[None]

    q = conv(p["wq"], p["bq"], x)
    k = conv(p["wk"], p["bk"], y)
    v = conv(p["wv"], p["bv"], y)
    attn = conv(p["wattn"], p["battn"], q + k)
    attn = jax.nn.softmax(attn, axis=2)
    agg = attn * v
    agg = jnp.concatenate([agg, x], axis=1)
    return conv(p["wa"], p["ba"], agg)


if __name__ == "__main__":
    fwd = jax.jit(attention_forward,
                  static_argnames=("tn", "compute_dtype", "out_dtype"))

    configs = [
        # (B, C1, C2, out_dim, N,  Ny,  tn,   compute_dtype, rel_tol)
        (2, 8, 8, 16, 16, 16, 512, jnp.float32, 1e-3),     # single fused tile, exact f32
        (2, 8, 8, 16, 500, 500, 128, jnp.bfloat16, 3e-2),  # 4 tiles, split stats, ragged
        (2, 8, 8, 16, 300, 1, 128, jnp.bfloat16, 3e-2),    # bcast y, 3 tiles, ragged
        (2, 8, 8, 16, 120, 1, 2048, jnp.bfloat16, 3e-2),   # bcast y, single fused tile
    ]
    key = jax.random.PRNGKey(0)
    for cfg in configs:
        B, C1, C2, out_dim, N, Ny, tn, cdt, tol = cfg
        key, kx, ky, kp = jax.random.split(key, 4)
        x = jax.random.normal(kx, (B, C1, N), jnp.float32)
        y = jax.random.normal(ky, (B, C2, Ny), jnp.float32)
        params = init_params(kp, C1, C2, out_dim)

        out = fwd(x, y, params, tn=tn, compute_dtype=cdt)
        jax.block_until_ready(out)

        ref = attention_ref(x, y, params)
        assert out.shape == (B, 128, N), (out.shape, cfg)
        err = float(jnp.max(jnp.abs(out.astype(jnp.float32) - ref)))
        scale = float(jnp.max(jnp.abs(ref)))
        assert err <= tol * max(1.0, scale), (cfg, err, scale)

    print("KERNEL_OK")
</pallas_src>

<mosaic_0001>
module attributes {stable_mosaic.version = 11 : i64} {
  func.func @kernel(%arg0: i32, %arg1: memref<1x8x128xf32, #tpu.memory_space<vmem>>, %arg2: memref<1x8x128xf32, #tpu.memory_space<vmem>>, %arg3: memref<144x8xf32, #tpu.memory_space<vmem>>, %arg4: memref<32x8xf32, #tpu.memory_space<vmem>>, %arg5: memref<16x1xf32, #tpu.memory_space<vmem>>, %arg6: memref<16x1xf32, #tpu.memory_space<vmem>>, %arg7: memref<128x16xf32, #tpu.memory_space<vmem>>, %arg8: memref<128x1xf32, #tpu.memory_space<vmem>>, %arg9: memref<1x128x128xf32, #tpu.memory_space<vmem>>) attributes {dimension_semantics = [#tpu.dimension_semantics<parallel>], iteration_bounds = array<i64: 2>, scalar_prefetch = 0 : i64, scratch_operands = 0 : i64, tpu.core_type = #tpu.core_type<tc>, window_params = [{transform_indices = @transform_0, window_bounds = array<i64: 1, 8, 128>}, {transform_indices = @transform_1, window_bounds = array<i64: 1, 8, 128>}, {pipeline_mode = #tpu.pipeline_mode<synchronous>, transform_indices = @transform_2, window_bounds = array<i64: 144, 8>}, {pipeline_mode = #tpu.pipeline_mode<synchronous>, transform_indices = @transform_3, window_bounds = array<i64: 32, 8>}, {pipeline_mode = #tpu.pipeline_mode<synchronous>, transform_indices = @transform_4, window_bounds = array<i64: 16, 1>}, {pipeline_mode = #tpu.pipeline_mode<synchronous>, transform_indices = @transform_5, window_bounds = array<i64: 16, 1>}, {pipeline_mode = #tpu.pipeline_mode<synchronous>, transform_indices = @transform_6, window_bounds = array<i64: 128, 16>}, {pipeline_mode = #tpu.pipeline_mode<synchronous>, transform_indices = @transform_7, window_bounds = array<i64: 128, 1>}, {transform_indices = @transform_8, window_bounds = array<i64: 1, 128, 128>}]} {
    %c0 = arith.constant 0 : index
    %c0_0 = arith.constant 0 : index
    %0 = vector.load %arg3[%c0, %c0_0] : memref<144x8xf32, #tpu.memory_space<vmem>>, vector<144x8xf32>
    %c0_1 = arith.constant 0 : index
    %c0_2 = arith.constant 0 : index
    %c0_3 = arith.constant 0 : index
    %1 = vector.load %arg1[%c0_1, %c0_2, %c0_3] : memref<1x8x128xf32, #tpu.memory_space<vmem>>, vector<1x8x128xf32>
    %2 = vector.shape_cast %1 : vector<1x8x128xf32> to vector<8x128xf32>
    %cst = arith.constant dense<0.000000e+00> : vector<144x128xf32>
    %3 = tpu.matmul %0, %2, %cst {dimension_numbers = #tpu.dot_dimension_numbers<[1], [0], [0], [1], [0, 0, 1, 1], [], []>} : vector<144x8xf32>, vector<8x128xf32>, vector<144x128xf32> -> vector<144x128xf32>
    %c0_4 = arith.constant 0 : index
    %c0_5 = arith.constant 0 : index
    %4 = vector.load %arg4[%c0_4, %c0_5] : memref<32x8xf32, #tpu.memory_space<vmem>>, vector<32x8xf32>
    %c0_6 = arith.constant 0 : index
    %c0_7 = arith.constant 0 : index
    %c0_8 = arith.constant 0 : index
    %5 = vector.load %arg2[%c0_6, %c0_7, %c0_8] : memref<1x8x128xf32, #tpu.memory_space<vmem>>, vector<1x8x128xf32>
    %6 = vector.shape_cast %5 : vector<1x8x128xf32> to vector<8x128xf32>
    %cst_9 = arith.constant dense<0.000000e+00> : vector<32x128xf32>
    %7 = tpu.matmul %4, %6, %cst_9 {dimension_numbers = #tpu.dot_dimension_numbers<[1], [0], [0], [1], [0, 0, 1, 1], [], []>} : vector<32x8xf32>, vector<8x128xf32>, vector<32x128xf32> -> vector<32x128xf32>
    %8 = vector.extract_strided_slice %3 {offsets = [0, 0], sizes = [16, 128], strides = [1, 1]} : vector<144x128xf32> to vector<16x128xf32>
    %9 = vector.extract_strided_slice %7 {offsets = [0, 0], sizes = [16, 128], strides = [1, 1]} : vector<32x128xf32> to vector<16x128xf32>
    %10 = arith.addf %8, %9 : vector<16x128xf32>
    %c0_10 = arith.constant 0 : index
    %c0_11 = arith.constant 0 : index
    %11 = vector.load %arg5[%c0_10, %c0_11] : memref<16x1xf32, #tpu.memory_space<vmem>>, vector<16x1xf32>
    %12 = vector.broadcast %11 : vector<16x1xf32> to vector<16x128xf32>
    %13 = arith.addf %10, %12 : vector<16x128xf32>
    %14 = vector.extract_strided_slice %7 {offsets = [16, 0], sizes = [16, 128], strides = [1, 1]} : vector<32x128xf32> to vector<16x128xf32>
    %c0_12 = arith.constant 0 : index
    %c0_13 = arith.constant 0 : index
    %15 = vector.load %arg6[%c0_12, %c0_13] : memref<16x1xf32, #tpu.memory_space<vmem>>, vector<16x1xf32>
    %16 = vector.broadcast %15 : vector<16x1xf32> to vector<16x128xf32>
    %17 = arith.addf %14, %16 : vector<16x128xf32>
    %18 = tpu.iota {dimensions = array<i32: 1>} : vector<16x128xi32>
    %c16_i32 = arith.constant 16 : i32
    %19 = vector.broadcast %c16_i32 : i32 to vector<16x128xi32>
    %20 = arith.cmpi slt, %18, %19 : vector<16x128xi32>
    %cst_14 = arith.constant -1.000000e+30 : f32
    %21 = vector.broadcast %cst_14 : f32 to vector<16x128xf32>
    %22 = arith.select %20, %13, %21 : vector<16x128xi1>, vector<16x128xf32>
    %cst_15 = arith.constant dense<0xFF800000> : vector<16xf32>
    %23 = vector.multi_reduction <maximumf>, %22, %cst_15 [1] : vector<16x128xf32> to vector<16xf32>
    %24 = vector.shape_cast %23 : vector<16xf32> to vector<16x1xf32>
    %25 = vector.broadcast %24 : vector<16x1xf32> to vector<16x128xf32>
    %26 = arith.subf %22, %25 : vector<16x128xf32>
    %27 = math.exp %26 : vector<16x128xf32>
    %cst_16 = arith.constant dense<0.000000e+00> : vector<16xf32>
    %28 = vector.multi_reduction <add>, %27, %cst_16 [1] : vector<16x128xf32> to vector<16xf32>
    %29 = vector.shape_cast %28 : vector<16xf32> to vector<16x1xf32>
    %cst_17 = arith.constant 1.000000e+00 : f32
    %30 = vector.broadcast %cst_17 : f32 to vector<16x1xf32>
    %31 = arith.divf %30, %29 : vector<16x1xf32>
    %32 = vector.broadcast %31 : vector<16x1xf32> to vector<16x128xf32>
    %33 = arith.mulf %27, %32 : vector<16x128xf32>
    %34 = arith.mulf %33, %17 : vector<16x128xf32>
    %c0_18 = arith.constant 0 : index
    %c0_19 = arith.constant 0 : index
    %35 = vector.load %arg7[%c0_18, %c0_19] : memref<128x16xf32, #tpu.memory_space<vmem>>, vector<128x16xf32>
    %cst_20 = arith.constant dense<0.000000e+00> : vector<128x128xf32>
    %36 = tpu.matmul %35, %34, %cst_20 {dimension_numbers = #tpu.dot_dimension_numbers<[1], [0], [0], [1], [0, 0, 1, 1], [], []>} : vector<128x16xf32>, vector<16x128xf32>, vector<128x128xf32> -> vector<128x128xf32>
    %37 = vector.extract_strided_slice %3 {offsets = [16, 0], sizes = [128, 128], strides = [1, 1]} : vector<144x128xf32> to vector<128x128xf32>
    %38 = arith.addf %36, %37 : vector<128x128xf32>
    %c0_21 = arith.constant 0 : index
    %c0_22 = arith.constant 0 : index
    %39 = vector.load %arg8[%c0_21, %c0_22] : memref<128x1xf32, #tpu.memory_space<vmem>>, vector<128x1xf32>
    %40 = vector.broadcast %39 : vector<128x1xf32> to vector<128x128xf32>
    %41 = arith.addf %38, %40 : vector<128x128xf32>
    %c0_23 = arith.constant 0 : index
    %c0_24 = arith.constant 0 : index
    %c0_25 = arith.constant 0 : index
    %42 = vector.load %arg9[%c0_23, %c0_24, %c0_25] : memref<1x128x128xf32, #tpu.memory_space<vmem>>, vector<1x128x128xf32>
    %43 = vector.shape_cast %42 : vector<1x128x128xf32> to vector<128x128xf32>
    %44 = vector.shape_cast %41 : vector<128x128xf32> to vector<1x128x128xf32>
    tpu.vector_store %arg9[%c0_23, %c0_24, %c0_25], %44 {strides = array<i32>} : memref<1x128x128xf32, #tpu.memory_space<vmem>>, vector<1x128x128xf32>,
    return
  }
  func.func @transform_0(%arg0: i32) -> (i32, i32, i32) {
    %c0_i32 = arith.constant 0 : i32
    %c0_i32_0 = arith.constant 0 : i32
    %c0_i32_1 = arith.constant 0 : i32
    return %arg0, %c0_i32, %c0_i32_0 : i32, i32, i32
  }
  func.func @transform_1(%arg0: i32) -> (i32, i32, i32) {
    %c0_i32 = arith.constant 0 : i32
    %c0_i32_0 = arith.constant 0 : i32
    %c0_i32_1 = arith.constant 0 : i32
    return %arg0, %c0_i32, %c0_i32_0 : i32, i32, i32
  }
  func.func @transform_2(%arg0: i32) -> (i32, i32) {
    %c0_i32 = arith.constant 0 : i32
    %c0_i32_0 = arith.constant 0 : i32
    %c0_i32_1 = arith.constant 0 : i32
    return %c0_i32, %c0_i32_0 : i32, i32
  }
  func.func @transform_3(%arg0: i32) -> (i32, i32) {
    %c0_i32 = arith.constant 0 : i32
    %c0_i32_0 = arith.constant 0 : i32
    %c0_i32_1 = arith.constant 0 : i32
    return %c0_i32, %c0_i32_0 : i32, i32
  }
  func.func @transform_4(%arg0: i32) -> (i32, i32) {
    %c0_i32 = arith.constant 0 : i32
    %c0_i32_0 = arith.constant 0 : i32
    %c0_i32_1 = arith.constant 0 : i32
    return %c0_i32, %c0_i32_0 : i32, i32
  }
  func.func @transform_5(%arg0: i32) -> (i32, i32) {
    %c0_i32 = arith.constant 0 : i32
    %c0_i32_0 = arith.constant 0 : i32
    %c0_i32_1 = arith.constant 0 : i32
    return %c0_i32, %c0_i32_0 : i32, i32
  }
  func.func @transform_6(%arg0: i32) -> (i32, i32) {
    %c0_i32 = arith.constant 0 : i32
    %c0_i32_0 = arith.constant 0 : i32
    %c0_i32_1 = arith.constant 0 : i32
    return %c0_i32, %c0_i32_0 : i32, i32
  }
  func.func @transform_7(%arg0: i32) -> (i32, i32) {
    %c0_i32 = arith.constant 0 : i32
    %c0_i32_0 = arith.constant 0 : i32
    %c0_i32_1 = arith.constant 0 : i32
    return %c0_i32, %c0_i32_0 : i32, i32
  }
  func.func @transform_8(%arg0: i32) -> (i32, i32, i32) {
    %c0_i32 = arith.constant 0 : i32
    %c0_i32_0 = arith.constant 0 : i32
    %c0_i32_1 = arith.constant 0 : i32
    return %arg0, %c0_i32, %c0_i32_0 : i32, i32, i32
  }
}

</mosaic_0001>

<bundles_post_ra>
// kernel: attention_forward.1
= control target key start
LH: loop header
LB: loop body
LE: loop exit
PB: predicated region body
PF: predicated region fallthrough
CT: control target
= control target key end

     0   :  { %s1365_s27 = smov 0   ;;  %s1645_s0 = inlined_call_operand.vmem [shape: f32[2,8,16], index: 0, kind: input, shape index: {}]   ;;  %s1646_s1 = inlined_call_operand.vmem [shape: f32[2,8,16], index: 1, kind: input, shape index: {}]   ;;  %s1647_s2 = inlined_call_operand.vmem [shape: f32[144,8], index: 2, kind: input, shape index: {}]   ;;  %s1648_s3 = inlined_call_operand.vmem [shape: f32[32,8], index: 3, kind: input, shape index: {}]   ;;  %s1649_s4 = inlined_call_operand.vmem [shape: f32[16,1], index: 4, kind: input, shape index: {}]   ;;  %s1650_s5 = inlined_call_operand.vmem [shape: f32[16,1], index: 5, kind: input, shape index: {}]   ;;  %s1651_s6 = inlined_call_operand.vmem [shape: f32[128,16], index: 6, kind: input, shape index: {}]   ;;  %s1652_s7 = inlined_call_operand.vmem [shape: f32[128,1], index: 7, kind: input, shape index: {}]   ;;  %s1653_s8 = inlined_call_operand.vmem [shape: f32[2,128,16], index: 8, kind: output, shape index: {}]  }
   0x1 LB: > { %s1113_s28 = sadd.s32 4294967295, %s1317_s27   ;;  %p1117_p0 = scmp.ge.s32.totalorder %s1317_s27, 1  ;;  %s1317_s27 = sphi %s1365_s27, %s18_s27  }
   0x2   : > { %p270_p1 = scmp.lt.s32.totalorder %s1317_s27, 3 }
   0x4   : > { %p271_p2 = pnand %p1117_p0, %p270_p1 }
   0x5   : > { %p307_p3 = scmp.lt.s32.totalorder (!%p271_p2), %s1113_s28, 1  ;;  %v320_v0 = vld [vmem:[%s1647_s2] sm:$0xff] (!%p271_p2)  ;;  %vm339_vm0 = vcmask (!%p271_p2), 64512   ;;  %v1319_v3 = vmov (!%p271_p2), 0   ;;  %v654_v4 = vld [vmem:[%s1649_s4 + $0x8] sm:$0xff] (!%p271_p2)  ;;  %v551_v9 = vld [vmem:[%s1648_s3 + $0x10] sm:$0xff] (!%p271_p2)  ;;  %v681_v11 = vlaneseq (!%p271_p2) }
   0x6   : > { %274 = sbr.rel (%p271_p2) target bundleno = 808 (0x328), region = 52  ;;  %v549_v1 = vld [vmem:[%s1648_s3] sm:$0xff] (!%p271_p2)  ;;  %1207 = vmatprep.mubr.msk.f32.mxu1 (!%p271_p2), %vm339_vm0, %v320_v0  ;;  %1301 = vset.pattern.permute.xlu0 (!%p271_p2), %v1319_v3  ;;  %v321_v6 = vld [vmem:[%s1647_s2 + $0x8] sm:$0xff] (!%p271_p2)  ;;  %v552_v10 = vld [vmem:[%s1648_s3 + $0x18] sm:$0xff] (!%p271_p2)  ;;  %vm724_vm2 = vcmask (!%p271_p2), 130048  }
   0x7   : > { %1236 = vmatprep.mubr.msk.f32.mxu0 (!%p271_p2), %vm339_vm0, %v549_v1  ;;  %v653_v2 = vld [vmem:[%s1649_s4] sm:$0xff] (!%p271_p2)  ;;  %1302 = vset.pattern.permute.xlu1 (!%p271_p2), %v1319_v3  ;;  %v550_v8 = vld [vmem:[%s1648_s3 + $0x8] sm:$0xff] (!%p271_p2)  ;;  %v682_v14 = vand.u32 (!%p271_p2), 127, %v681_v11  ;;  %v920_v34 = vld [vmem:[%s1652_s7 + $0x10] sm:$0xff] (!%p271_p2) }
   0x8   : > { %657 = vperm.xlu0 (!%p271_p2), %1301, %v653_v2   ;;  %v667_v33 = vld [vmem:[%s1650_s5] sm:$0xff] (!%p271_p2)  ;;  %v668_v36 = vld [vmem:[%s1650_s5 + $0x8] sm:$0xff] (!%p271_p2)  ;;  %v928_v40 = vld [vmem:[%s1652_s7 + $0x50] sm:$0xff] (!%p271_p2) }
   0x9   : > { %vm683_vm1 = vcmp.lt.s32.totalorder (!%p271_p2), %v682_v14, 16  ;;  %v926_v38 = vld [vmem:[%s1652_s7 + $0x40] sm:$0xff] (!%p271_p2)  ;;  %v919_v41 = vld [vmem:[%s1652_s7 + $0x8] sm:$0xff] (!%p271_p2)  ;;  %v921_v43 = vld [vmem:[%s1652_s7 + $0x18] sm:$0xff] (!%p271_p2) }
   0xa   : > { %v918_v39 = vld [vmem:[%s1652_s7] sm:$0xff] (!%p271_p2)  ;;  %v932_v44 = vld [vmem:[%s1652_s7 + $0x70] sm:$0xff] (!%p271_p2)  ;;  %v323_v47 = vld [vmem:[%s1647_s2 + $0x18] sm:$0xff] (!%p271_p2) }
   0xb   : > { %v930_v42 = vld [vmem:[%s1652_s7 + $0x60] sm:$0xff] (!%p271_p2)  ;;  %v322_v45 = vld [vmem:[%s1647_s2 + $0x10] sm:$0xff] (!%p271_p2)  ;;  %v325_v50 = vld [vmem:[%s1647_s2 + $0x28] sm:$0xff] (!%p271_p2) }
   0xc   : > { %662 = vperm.xlu0 (!%p271_p2), %1301, %v654_v4   ;;  %v708_v46 = vld [vmem:[%s1651_s6] sm:$0xff] (!%p271_p2)  ;;  %v923_v51 = vld [vmem:[%s1652_s7 + $0x28] sm:$0xff] (!%p271_p2)  ;;  %v326_v52 = vld [vmem:[%s1647_s2 + $0x30] sm:$0xff] (!%p271_p2) }
   0xd   : > { %s1655_s28 = smov (!%p307_p3, %s1113_s28), 1  ;;  %v922_v48 = vld [vmem:[%s1652_s7 + $0x20] sm:$0xff]  ;;  %v327_v53 = vld [vmem:[%s1647_s2 + $0x38] sm:$0xff]  ;;  %v924_v54 = vld [vmem:[%s1652_s7 + $0x30] sm:$0xff] }
   0xe   : > { %s1118_s13 = sshll.u32 %s1655_s28, 3  ;;  %v324_v49 = vld [vmem:[%s1647_s2 + $0x20] sm:$0xff]  ;;  %v329_v56 = vld [vmem:[%s1647_s2 + $0x48] sm:$0xff]  ;;  %v925_v57 = vld [vmem:[%s1652_s7 + $0x38] sm:$0xff]  ;;  %s1162_s10 = sshll.u32 %s1655_s28, 7 }
   0xf   : > { %s310_s18 = scalar_lea.vmem %s1645_s0, %s1118_s13  ;;  %s314_s21 = scalar_lea.vmem %s1646_s1, %s1118_s13  ;;  %v328_v55 = vld [vmem:[%s1647_s2 + $0x40] sm:$0xff]  ;;  %v330_v58 = vld [vmem:[%s1647_s2 + $0x50] sm:$0xff]  ;;  %v331_v59 = vld [vmem:[%s1647_s2 + $0x58] sm:$0xff] }
  0x10   : > { %v338_v5 = vld [vmem:[%s310_s18] sm:$0xff]  ;;  %v927_v60 = vld [vmem:[%s1652_s7 + $0x48] sm:$0xff]  ;;  %v929_v63 = vld [vmem:[%s1652_s7 + $0x58] sm:$0xff]  ;;  %s1620_s13 = scalar_lea.vmem %s1653_s8, %s1162_s10 }
  0x11   : > { %1205 = vmatprep.subr.mxu1 %v338_v5  ;;  %v553_v7 = vld [vmem:[%s314_s21] sm:$0xff]  ;;  %v333_v62 = vld [vmem:[%s1647_s2 + $0x68] sm:$0xff]  ;;  %v334_v0 = vld [vmem:[%s1647_s2 + $0x70] sm:$0xff] }
  0x12   : > { %1234 = vmatprep.subr.mxu0 %v553_v7  ;;  %1206 = vmatpush3.msra.mxu1 %v338_v5  ;;  %v332_v61 = vld [vmem:[%s1647_s2 + $0x60] sm:$0xff]  ;;  %v335_v1 = vld [vmem:[%s1647_s2 + $0x78] sm:$0xff]  ;;  %v931_v2 = vld [vmem:[%s1652_s7 + $0x68] sm:$0xff] }
  0x13   : > { %1235 = vmatpush3.msra.mxu0 %v553_v7  ;;  %1208 = vmatmul.mubr.msk.f32.vlgmr.msra.gmra.mrb[0].mxu1 %vm339_vm0, %v321_v6  ;;  %v336_v3 = vld [vmem:[%s1647_s2 + $0x80] sm:$0xff]  ;;  %v337_v4 = vld [vmem:[%s1647_s2 + $0x88] sm:$0xff]  ;;  %v933_v5 = vld [vmem:[%s1652_s7 + $0x78] sm:$0xff] }
  0x14   : > { %1237 = vmatmul.mubr.msk.f32.vlgmr.msra.gmra.mrb[0].mxu0 %vm339_vm0, %v550_v8  ;;  %1210 = vmatprep.mubr.msk.f32.mxu1 %vm339_vm0, %v322_v45 }
  0x15   : > { %1239 = vmatprep.mubr.msk.f32.mxu0 %vm339_vm0, %v551_v9 }
  0x17   : > { %1211 = vmatmul.mubr.msk.f32.gmra.mrb[2].mxu1 %vm339_vm0, %v323_v47 }
  0x18   : > { %1240 = vmatmul.mubr.msk.f32.gmra.mrb[2].mxu0 %vm339_vm0, %v552_v10  ;;  %1213 = vmatprep.mubr.msk.f32.mxu1 %vm339_vm0, %v324_v49 }
  0x19   : > { %1246 = vmatprep.mubr.msk.f32.mxu0 %vm724_vm2, %v708_v46 }
  0x1b   : > { %1214 = vmatmul.mubr.msk.f32.gmra.mrb[4].mxu1 %vm339_vm0, %v325_v50 }
  0x1c   : > { %1216 = vmatprep.mubr.msk.f32.mxu1 %vm339_vm0, %v326_v52 }
  0x1f   : > { %1217 = vmatmul.mubr.msk.f32.gmra.mrb[6].mxu1 %vm339_vm0, %v327_v53 }
  0x20   : > { %1219 = vmatprep.mubr.msk.f32.mxu1 %vm339_vm0, %v328_v55 }
  0x23   : > { %1220 = vmatmul.mubr.msk.f32.gmra.mrb[8].mxu1 %vm339_vm0, %v329_v56 }
  0x24   : > { %1222 = vmatprep.mubr.msk.f32.mxu1 %vm339_vm0, %v330_v58 }
  0x27   : > { %1223 = vmatmul.mubr.msk.f32.gmra.mrb[10].mxu1 %vm339_vm0, %v331_v59 }
  0x28   : > { %1225 = vmatprep.mubr.msk.f32.mxu1 %vm339_vm0, %v332_v61 }
  0x2b   : > { %1226 = vmatmul.mubr.msk.f32.gmra.mrb[12].mxu1 %vm339_vm0, %v333_v62 }
  0x2c   : > { %1228 = vmatprep.mubr.msk.f32.mxu1 %vm339_vm0, %v334_v0 }
  0x2f   : > { %1229 = vmatmul.mubr.msk.f32.gmra.mrb[14].mxu1 %vm339_vm0, %v335_v1 }
  0x30   : > { %1231 = vmatprep.mubr.msk.f32.mxu1 %vm339_vm0, %v336_v3 }
  0x33   : > { %1232 = vmatmul.mubr.msk.f32.gmra.mrb[16].mxu1 %vm339_vm0, %v337_v4 }
  0x87   : > { %v658_v12 = vpop.permute.xlu0 %657 }
  0x8b   : > { %v663_v20 = vpop.permute.xlu0 %662 }
  0xe6   : > { %v1209_v13 = vpop.f32.mrb[0].mxu1 }
  0xe7   : > { %v1238_v15 = vpop.f32.mrb[0].mxu0  ;;  %v460_v16 = vpop.f32.mrb[1].mxu1 }
  0xe8   : > { %v652_v17 = vadd.f32 %v1238_v15, %v1209_v13  ;;  %v632_v18 = vpop.f32.mrb[1].mxu0 }
  0xe9   : > { %v651_v19 = vadd.f32 %v632_v18, %v460_v16 }
  0xea   : > { %v666_v22 = vadd.f32 %v663_v20, %v652_v17  ;;  %v710_v20 = vld [vmem:[%s1651_s6 + $0x10] sm:$0xff] }
  0xeb   : > { %v665_v21 = vadd.f32 %v658_v12, %v651_v19  ;;  %v1424_v35 = vpop.f32.mrb[2].mxu0  ;;  %v709_v19 = vld [vmem:[%s1651_s6 + $0x8] sm:$0xff] }
  0xec   : > { %v685_v24 = vsel %vm683_vm1, %v666_v22, -1e+30  ;;  %v1429_v37 = vpop.f32.mrb[3].mxu0  ;;  %v712_v22 = vld [vmem:[%s1651_s6 + $0x20] sm:$0xff] }
  0xed   : > { %v684_v23 = vsel %vm683_vm1, %v665_v21, -1e+30  ;;  %v711_v21 = vld [vmem:[%s1651_s6 + $0x18] sm:$0xff] }
  0xee   : > { %686 = vmax.xlane.f32.xlu1 %v684_v23 }
  0xf2   : > { %688 = vmax.xlane.f32.xlu1 %v685_v24 }
 0x17b   : > { %v687_v25 = vpop.xlane.xlu1 %686 }
 0x17c   : > { %v690_v26 = vsub.f32 %v684_v23, %v687_v25  ;;  %v713_v23 = vld [vmem:[%s1651_s6 + $0x28] sm:$0xff]  ;;  %v715_v25 = vld [vmem:[%s1651_s6 + $0x38] sm:$0xff] }
 0x17e   : > { %v692_v27 = vmul.f32 1.442695, %v690_v26  ;;  %v716_v26 = vld [vmem:[%s1651_s6 + $0x40] sm:$0xff] }
 0x17f   : > { %v689_v28 = vpop.xlane.xlu1 %688 }
 0x180   : > { %1303 = vpow2.f32 %v692_v27  ;;  %v691_v29 = vsub.f32 %v685_v24, %v689_v28  ;;  %v714_v24 = vld [vmem:[%s1651_s6 + $0x30] sm:$0xff]  ;;  %v717_v27 = vld [vmem:[%s1651_s6 + $0x48] sm:$0xff] }
 0x181   : > { %v718_v28 = vld [vmem:[%s1651_s6 + $0x50] sm:$0xff] }
 0x182   : > { %v694_v30 = vmul.f32 1.442695, %v691_v29  ;;  %v719_v29 = vld [vmem:[%s1651_s6 + $0x58] sm:$0xff] }
 0x184   : > { %1305 = vpow2.f32 %v694_v30  ;;  %v720_v30 = vld [vmem:[%s1651_s6 + $0x60] sm:$0xff] }
 0x18a   : > { %v1412_v31 = vpop.eup %1303 }
 0x18b   : > { %696 = vadd.xlane.f32.xlu0 %v1412_v31 }
 0x18e   : > { %v1415_v32 = vpop.eup %1305 }
 0x18f   : > { %698 = vadd.xlane.f32.xlu1 %v1415_v32 }
 0x1a0   : > { %671 = vperm.xlu1 %1302, %v667_v33   ;;  %v723_v33 = vld [vmem:[%s1651_s6 + $0x78] sm:$0xff] }
 0x1a1   : > { %946 = vperm.xlu0 %1301, %v920_v34   ;;  %v1212_v34 = vpop.f32.mrb[2].mxu1 }
 0x1a4   : > { %676 = vperm.xlu1 %1302, %v668_v36  }
 0x1a5   : > { %976 = vperm.xlu0 %1301, %v926_v38  }
 0x1a8   : > { %936 = vperm.xlu1 %1302, %v918_v39  }
 0x1a9   : > { %986 = vperm.xlu0 %1301, %v928_v40  }
 0x1ac   : > { %941 = vperm.xlu1 %1302, %v919_v41  }
 0x1ad   : > { %996 = vperm.xlu0 %1301, %v930_v42  }
 0x1b0   : > { %951 = vperm.xlu1 %1302, %v921_v43  }
 0x1b1   : > { %1006 = vperm.xlu0 %1301, %v932_v44  }
 0x1b4   : > { %956 = vperm.xlu1 %1302, %v922_v48  }
 0x1b8   : > { %961 = vperm.xlu1 %1302, %v923_v51  }
 0x1bc   : > { %966 = vperm.xlu1 %1302, %v924_v54  }
 0x1c0   : > { %971 = vperm.xlu1 %1302, %v925_v57  }
 0x1c4   : > { %981 = vperm.xlu1 %1302, %v927_v60  }
 0x1c8   : > { %991 = vperm.xlu1 %1302, %v929_v63  }
 0x1cc   : > { %1001 = vperm.xlu1 %1302, %v931_v2  }
 0x1d0   : > { %1011 = vperm.xlu1 %1302, %v933_v5  }
 0x218   : > { %v697_v6 = vpop.xlane.xlu0 %696 }
 0x219   : > { %1307 = vrcp.f32 %v697_v6 }
 0x21c   : > { %v699_v7 = vpop.xlane.xlu1 %698 }
 0x21d   : > { %1309 = vrcp.f32 %v699_v7 }
 0x220   : > { %v672_v8 = vpop.permute.xlu1 %671  ;;  %v947_v3 = vpop.permute.xlu0 %946 }
 0x221   : > { %v679_v11 = vadd.f32 %v672_v8, %v1429_v37 }
 0x223   : > { %v1308_v9 = vpop.eup %1307 }
 0x224   : > { %v677_v10 = vpop.permute.xlu1 %676  ;;  %v704_v12 = vmul.f32 %v1308_v9, %v1412_v31  ;;  %v721_v31 = vld [vmem:[%s1651_s6 + $0x68] sm:$0xff] }
 0x225   : > { %v680_v15 = vadd.f32 %v1424_v35, %v677_v10  ;;  %v470_v35 = vpop.f32.mrb[3].mxu1 }
 0x226   : > { %v706_v16 = vmul.f32 %v704_v12, %v679_v11  ;;  %v1215_v36 = vpop.f32.mrb[4].mxu1 }
 0x227   : > { %v1310_v13 = vpop.eup %1309  ;;  %v480_v37 = vpop.f32.mrb[5].mxu1 }
 0x228   : > { %v705_v14 = vmul.f32 %v1310_v13, %v1415_v32  ;;  %v722_v32 = vld [vmem:[%s1651_s6 + $0x70] sm:$0xff]  ;;  %v1218_v38 = vpop.f32.mrb[6].mxu1  ;;  %v937_v50 = vpop.permute.xlu1 %936 }
 0x229   : > { %v490_v39 = vpop.f32.mrb[7].mxu1 }
 0x22a   : > { %v707_v17 = vmul.f32 %v705_v14, %v680_v15  ;;  %v1221_v40 = vpop.f32.mrb[8].mxu1  ;;  %v977_v14 = vpop.permute.xlu0 %976 }
 0x22b   : > { %v500_v41 = vpop.f32.mrb[9].mxu1 }
 0x22c   : > { %v1270_v18 = vpack.c.bf16 %v707_v17, %v706_v16  ;;  %v1224_v42 = vpop.f32.mrb[10].mxu1  ;;  %v942_v51 = vpop.permute.xlu1 %941 }
 0x22d   : > { %v510_v43 = vpop.f32.mrb[11].mxu1 }
 0x22e   : > { %1271 = vmatprep.subr.bf16.mxu0 %v1270_v18  ;;  %v1227_v44 = vpop.f32.mrb[12].mxu1 }
 0x22f   : > { %1273 = vmatpush3.bf16.msra.mxu0 %v1270_v18  ;;  %v520_v45 = vpop.f32.mrb[13].mxu1 }
 0x230   : > { %v1608_v46 = vpop.f32.mrb[14].mxu1  ;;  %v952_v52 = vpop.permute.xlu1 %951 }
 0x231   : > { %v1610_v47 = vpop.f32.mrb[15].mxu1 }
 0x232   : > { %1247 = vmatmul.mubr.msk.f32.vlgmr.msra.gmra.mrb[4].mxu0 %vm724_vm2, %v709_v19  ;;  %v1612_v48 = vpop.f32.mrb[16].mxu1 }
 0x233   : > { %1249 = vmatprep.mubr.msk.f32.mxu0 %vm724_vm2, %v710_v20  ;;  %v1614_v49 = vpop.f32.mrb[17].mxu1 }
 0x234   : > { %v957_v53 = vpop.permute.xlu1 %956 }
 0x236   : > { %1250 = vmatmul.mubr.msk.f32.gmra.mrb[6].mxu0 %vm724_vm2, %v711_v21 }
 0x237   : > { %1252 = vmatprep.mubr.msk.f32.mxu0 %vm724_vm2, %v712_v22 }
 0x238   : > { %v962_v54 = vpop.permute.xlu1 %961 }
 0x23a   : > { %1253 = vmatmul.mubr.msk.f32.gmra.mrb[8].mxu0 %vm724_vm2, %v713_v23 }
 0x23b   : > { %1255 = vmatprep.mubr.msk.f32.mxu0 %vm724_vm2, %v714_v24 }
 0x23c   : > { %v967_v55 = vpop.permute.xlu1 %966 }
 0x23e   : > { %1256 = vmatmul.mubr.msk.f32.gmra.mrb[10].mxu0 %vm724_vm2, %v715_v25  ;;  %v987_v25 = vpop.permute.xlu0 %986 }
 0x23f   : > { %1258 = vmatprep.mubr.msk.f32.mxu0 %vm724_vm2, %v716_v26 }
 0x240   : > { %v972_v1 = vpop.permute.xlu1 %971 }
 0x242   : > { %1259 = vmatmul.mubr.msk.f32.gmra.mrb[12].mxu0 %vm724_vm2, %v717_v27 }
 0x243   : > { %1261 = vmatprep.mubr.msk.f32.mxu0 %vm724_vm2, %v718_v28 }
 0x244   : > { %v982_v11 = vpop.permute.xlu1 %981 }
 0x246   : > { %1262 = vmatmul.mubr.msk.f32.gmra.mrb[14].mxu0 %vm724_vm2, %v719_v29 }
 0x247   : > { %1264 = vmatprep.mubr.msk.f32.mxu0 %vm724_vm2, %v720_v30 }
 0x248   : > { %v992_v23 = vpop.permute.xlu1 %991 }
 0x24a   : > { %1265 = vmatmul.mubr.msk.f32.gmra.mrb[16].mxu0 %vm724_vm2, %v721_v31 }
 0x24b   : > { %1267 = vmatprep.mubr.msk.f32.mxu0 %vm724_vm2, %v722_v32 }
 0x24e   : > { %1268 = vmatmul.mubr.msk.f32.gmra.mrb[18].mxu0 %vm724_vm2, %v723_v33  ;;  %v1002_v33 = vpop.permute.xlu1 %1001 }
 0x305   : > { %v1248_v56 = vpop.f32.mrb[4].mxu0 }
 0x306   : > { %v845_v57 = vadd.f32 %v1248_v56, %v1212_v34  ;;  %v839_v58 = vpop.f32.mrb[5].mxu0 }
 0x307   : > { %v840_v59 = vadd.f32 %v839_v58, %v470_v35 }
 0x308   : > { %v1015_v60 = vadd.f32 %v942_v51, %v845_v57 }
 0x309   : > { %v1014_v61 = vadd.f32 %v937_v50, %v840_v59  ;;  %v1251_v62 = vpop.f32.mrb[6].mxu0 }
 0x30a   : > { %1031 = vst [vmem:[%s1620_s13 + $0x8] sm:$0xff] %v1015_v60  ;;  %v855_v63 = vadd.f32 %v1251_v62, %v1215_v36  ;;  %v849_v0 = vpop.f32.mrb[7].mxu0  ;;  %v997_v36 = vpop.permute.xlu0 %996 }
 0x30b   : > { %1030 = vst [vmem:[%s1620_s13] sm:$0xff] %v1014_v61  ;;  %v850_v2 = vadd.f32 %v849_v0, %v480_v37 }
 0x30c   : > { %v1017_v4 = vadd.f32 %v952_v52, %v855_v63 }
 0x30d   : > { %v1016_v5 = vadd.f32 %v947_v3, %v850_v2  ;;  %v1254_v6 = vpop.f32.mrb[8].mxu0 }
 0x30e   : > { %1033 = vst [vmem:[%s1620_s13 + $0x18] sm:$0xff] %v1017_v4  ;;  %v865_v7 = vadd.f32 %v1254_v6, %v1218_v38  ;;  %v859_v8 = vpop.f32.mrb[9].mxu0  ;;  %v1007_v51 = vpop.permute.xlu0 %1006 }
 0x30f   : > { %1032 = vst [vmem:[%s1620_s13 + $0x10] sm:$0xff] %v1016_v5  ;;  %v860_v9 = vadd.f32 %v859_v8, %v490_v39 }
 0x310   : > { %v1019_v10 = vadd.f32 %v962_v54, %v865_v7 }
 0x311   : > { %v1018_v12 = vadd.f32 %v957_v53, %v860_v9  ;;  %v1257_v13 = vpop.f32.mrb[10].mxu0 }
 0x312   : > { %1035 = vst [vmem:[%s1620_s13 + $0x28] sm:$0xff] %v1019_v10  ;;  %v875_v15 = vadd.f32 %v1257_v13, %v1221_v40  ;;  %v869_v16 = vpop.f32.mrb[11].mxu0 }
 0x313   : > { %1034 = vst [vmem:[%s1620_s13 + $0x20] sm:$0xff] %v1018_v12  ;;  %v870_v17 = vadd.f32 %v869_v16, %v500_v41 }
 0x314   : > { %v1021_v18 = vadd.f32 %v972_v1, %v875_v15 }
 0x315   : > { %v1020_v19 = vadd.f32 %v967_v55, %v870_v17  ;;  %v1260_v20 = vpop.f32.mrb[12].mxu0 }
 0x316   : > { %1037 = vst [vmem:[%s1620_s13 + $0x38] sm:$0xff] %v1021_v18  ;;  %v885_v21 = vadd.f32 %v1260_v20, %v1224_v42  ;;  %v879_v22 = vpop.f32.mrb[13].mxu0 }
 0x317   : > { %1036 = vst [vmem:[%s1620_s13 + $0x30] sm:$0xff] %v1020_v19  ;;  %v880_v24 = vadd.f32 %v879_v22, %v510_v43 }
 0x318   : > { %v1023_v26 = vadd.f32 %v982_v11, %v885_v21 }
 0x319   : > { %v1022_v27 = vadd.f32 %v977_v14, %v880_v24  ;;  %v1263_v28 = vpop.f32.mrb[14].mxu0 }
 0x31a   : > { %1039 = vst [vmem:[%s1620_s13 + $0x48] sm:$0xff] %v1023_v26  ;;  %v895_v29 = vadd.f32 %v1263_v28, %v1227_v44  ;;  %v889_v30 = vpop.f32.mrb[15].mxu0 }
 0x31b   : > { %1038 = vst [vmem:[%s1620_s13 + $0x40] sm:$0xff] %v1022_v27  ;;  %v890_v31 = vadd.f32 %v889_v30, %v520_v45  ;;  %v1012_v45 = vpop.permute.xlu1 %1011 }
 0x31c   : > { %v1025_v32 = vadd.f32 %v992_v23, %v895_v29 }
 0x31d   : > { %v1024_v34 = vadd.f32 %v987_v25, %v890_v31  ;;  %v1266_v35 = vpop.f32.mrb[16].mxu0 }
 0x31e   : > { %1041 = vst [vmem:[%s1620_s13 + $0x58] sm:$0xff] %v1025_v32  ;;  %v905_v37 = vadd.f32 %v1266_v35, %v1608_v46  ;;  %v899_v38 = vpop.f32.mrb[17].mxu0 }
 0x31f   : > { %1040 = vst [vmem:[%s1620_s13 + $0x50] sm:$0xff] %v1024_v34  ;;  %v900_v39 = vadd.f32 %v899_v38, %v1610_v47 }
 0x320   : > { %v1027_v40 = vadd.f32 %v1002_v33, %v905_v37 }
 0x321   : > { %v1026_v41 = vadd.f32 %v997_v36, %v900_v39  ;;  %v1269_v42 = vpop.f32.mrb[18].mxu0 }
 0x322   : > { %1043 = vst [vmem:[%s1620_s13 + $0x68] sm:$0xff] %v1027_v40  ;;  %v915_v43 = vadd.f32 %v1269_v42, %v1612_v48  ;;  %v909_v44 = vpop.f32.mrb[19].mxu0 }
 0x323   : > { %1042 = vst [vmem:[%s1620_s13 + $0x60] sm:$0xff] %v1026_v41  ;;  %v910_v50 = vadd.f32 %v909_v44, %v1614_v49 }
 0x324   : > { %v1029_v52 = vadd.f32 %v1012_v45, %v915_v43 }
 0x325   : > { %v1028_v46 = vadd.f32 %v1007_v51, %v910_v50 }
 0x326   : > { %1045 = vst [vmem:[%s1620_s13 + $0x78] sm:$0xff] %v1029_v52 }
 0x327   : > { %1044 = vst [vmem:[%s1620_s13 + $0x70] sm:$0xff] %v1028_v46 }
 0x328 PF: > { %s18_s27 = sadd.s32 1, %s1317_s27  }
 0x329   : > { %p15_p4 = scmp.ge.s32.totalorder %s18_s27, 4  }
 0x32b   :  { %17 = sbr.rel (!%p15_p4) target bundleno = 1 (0x1), region = 85 }

</bundles_post_ra>
